<compile_context>
chip_gen: v6e
topology: v6e:2x2x1
jax: 0.10.0
libtpu: 0.0.40
codegen_flags: <defaults>
</compile_context>

<pallas_src>
import functools

import jax
import jax.numpy as jnp
from jax import lax
from jax.experimental import pallas as pl
from jax.experimental.pallas import tpu as pltpu


def deeplab_sml_kernel(x_ref, w_ref, wt_ref, b_row_ref, b_col_ref,
                       means_ref, inv_sigma_ref, logits_ref, sml_ref):
    x = x_ref[...]                                        # (tm, Cin), bf16

    # ---- logits output path: (tm, Cin) @ (Cin, C) on the MXU, f32 accumulate.
    logits = jnp.dot(x, w_ref[...], preferred_element_type=jnp.float32)
    logits = logits + b_row_ref[...]                      # (1, C) broadcast
    logits_ref[...] = logits.astype(logits_ref.dtype)

    # ---- SML path, computed transposed so pixels live along lanes.
    # logits_t[c, m] = sum_k w[k, c] * x[m, k]  == (x @ w)^T  (NT matmul).
    logits_t = lax.dot_general(
        wt_ref[...], x, (((1,), (1,)), ((), ())),
        preferred_element_type=jnp.float32)               # (C, tm)
    logits_t = logits_t + b_col_ref[...]                  # (C, 1) broadcast

    C = logits_t.shape[0]
    # max over channels (sublane reduce -> lane-dense (1, tm) result)
    maxv = jnp.max(logits_t, axis=0, keepdims=True)                    # (1, tm)
    # argmax (first maximal channel) via masked iota-min
    iota_c = lax.broadcasted_iota(jnp.int32, logits_t.shape, 0)        # (C, tm)
    idx = jnp.min(jnp.where(logits_t == maxv, iota_c, C),
                  axis=0, keepdims=True)                               # (1, tm)
    onehot = iota_c == idx                                             # (C, tm)
    # gather means[c], 1/sigma[c] via one-hot masked sums over channels
    mean_c = jnp.sum(jnp.where(onehot, means_ref[...], 0.0),
                     axis=0, keepdims=True)                            # (1, tm)
    isig_c = jnp.sum(jnp.where(onehot, inv_sigma_ref[...], 0.0),
                     axis=0, keepdims=True)                            # (1, tm)
    # sml = -(max - mean) / sigma  ==  (mean - max) * (1/sigma)
    sml = (mean_c - maxv) * isig_c                                     # (1, tm)
    sml_ref[...] = sml.reshape(sml_ref.shape)             # (1, 1, tm), lane-dense


def _pick_tile(M, tm_req):
    """Largest multiple of 128 that divides M, <= tm_req, keeping >=2 grid steps
    when possible (v7x has two TensorCores per chip)."""
    tm = max(128, min(tm_req, M))
    tm -= tm % 128
    while (M % tm != 0) or (M // tm < 2 and tm > 128):
        tm -= 128
    return tm


def deeplab_sml_nhwc(x_nhwc, w_cls, b_cls, means, sigma, *,
                     tm=2048,
                     compute_dtype=jnp.bfloat16,
                     logits_dtype=jnp.float32):
    """Fast path: channels-last input [N, H, W, Cin] -> (logits [N,H,W,C], sml [N,H,W]).

    No layout transposes anywhere on this path.
    """
    N, H, W, Cin = x_nhwc.shape
    C = w_cls.shape[1]
    M = N * H * W
    # TODO(synk): pad M up to a multiple of 128 for arbitrary spatial sizes.
    assert M % 128 == 0, "N*H*W must be a multiple of 128"
    tm = _pick_tile(M, tm)
    grid_m = M // tm

    # bf16 matmul inputs (f32 accumulation inside the kernel).
    x_flat = x_nhwc.reshape(M, Cin).astype(compute_dtype)
    w = w_cls.astype(compute_dtype)                       # (Cin, C)
    wt = jnp.transpose(w_cls).astype(compute_dtype)       # (C, Cin) for NT matmul
    b_row = b_cls.reshape(1, C).astype(jnp.float32)
    b_col = b_cls.reshape(C, 1).astype(jnp.float32)
    means_col = means.reshape(C, 1).astype(jnp.float32)
    inv_sigma_col = (1.0 / sigma).reshape(C, 1).astype(jnp.float32)

    logits_flat, sml_blocks = pl.pallas_call(
        deeplab_sml_kernel,
        out_shape=(
            jax.ShapeDtypeStruct((M, C), logits_dtype),
            jax.ShapeDtypeStruct((grid_m, 1, tm), jnp.float32),
        ),
        grid_spec=pltpu.PrefetchScalarGridSpec(
            num_scalar_prefetch=0,
            grid=(grid_m,),
            in_specs=[
                pl.BlockSpec((tm, Cin), lambda i: (i, 0)),   # pixel rows
                pl.BlockSpec((Cin, C), lambda i: (0, 0)),    # classifier weight
                pl.BlockSpec((C, Cin), lambda i: (0, 0)),    # weight, transposed
                pl.BlockSpec((1, C), lambda i: (0, 0)),      # bias (row)
                pl.BlockSpec((C, 1), lambda i: (0, 0)),      # bias (col)
                pl.BlockSpec((C, 1), lambda i: (0, 0)),      # means (col)
                pl.BlockSpec((C, 1), lambda i: (0, 0)),      # 1/sigma (col)
            ],
            out_specs=[
                pl.BlockSpec((tm, C), lambda i: (i, 0)),         # logits
                pl.BlockSpec((1, 1, tm), lambda i: (i, 0, 0)),   # sml (lane-dense)
            ],
        ),
        compiler_params=pltpu.CompilerParams(
            dimension_semantics=("parallel",),
            vmem_limit_bytes=48 * 1024 * 1024,
        ),
    )(x_flat, w, wt, b_row, b_col, means_col, inv_sigma_col)

    logits = logits_flat.reshape(N, H, W, C)
    sml = sml_blocks.reshape(N, H, W)
    return logits, sml


def deeplab_sml(x, w_cls, b_cls, means, sigma, *, tm=2048,
                compute_dtype=jnp.bfloat16, logits_dtype=jnp.float32):
    """PyTorch-layout compatibility wrapper.

    x: [N, Cin, H, W] (NCHW).  Returns (logits [N, C, H, W], sml [N, H, W]).
    The NCHW<->NHWC transposes are layout plumbing only; use deeplab_sml_nhwc
    directly when producer/consumer are channels-last to avoid them.
    """
    x_nhwc = jnp.transpose(x, (0, 2, 3, 1))
    logits_nhwc, sml = deeplab_sml_nhwc(
        x_nhwc, w_cls, b_cls, means, sigma, tm=tm,
        compute_dtype=compute_dtype, logits_dtype=logits_dtype)
    logits = jnp.transpose(logits_nhwc, (0, 3, 1, 2))
    return logits, sml


def _reference(x, w_cls, b_cls, means, sigma, compute_dtype=jnp.bfloat16):
    """Pure-JAX reference of the same forward (same bf16 matmul inputs)."""
    xf = jnp.transpose(x, (0, 2, 3, 1)).astype(compute_dtype)          # NHWC
    logits = jnp.einsum('nhwk,kc->nhwc', xf, w_cls.astype(compute_dtype),
                        preferred_element_type=jnp.float32) + b_cls
    logits_nchw = jnp.transpose(logits, (0, 3, 1, 2))
    max_logit = jnp.max(logits, axis=-1)
    c = jnp.argmax(logits, axis=-1)
    sml = -(max_logit - means[c]) / sigma[c]
    return logits_nchw, sml


if __name__ == "__main__":
    key = jax.random.PRNGKey(0)
    k_x, k_w, k_b, k_m, k_s = jax.random.split(key, 5)

    # Small shapes consistent with the module's forward.
    N, Cin, H, W = 2, 4, 16, 16
    num_classes = 40  # deeplabv3_resnet101(num_classes=40) in __init__

    x = jax.random.normal(k_x, (N, Cin, H, W), dtype=jnp.float32)

    # Deterministic synthetic parameters / buffers.
    w_cls = jax.random.normal(k_w, (Cin, num_classes), dtype=jnp.float32) * 0.1
    b_cls = jax.random.normal(k_b, (num_classes,), dtype=jnp.float32) * 0.01
    means = jax.random.uniform(k_m, (num_classes,), dtype=jnp.float32)        # ~ torch.rand
    sigma = jax.random.uniform(k_s, (num_classes,), dtype=jnp.float32,
                               minval=0.5, maxval=1.0)                        # sigma > 0

    logits, sml = deeplab_sml(x, w_cls, b_cls, means, sigma)
    jax.block_until_ready((logits, sml))

    ref_logits, ref_sml = _reference(x, w_cls, b_cls, means, sigma)
    assert logits.shape == (N, num_classes, H, W)
    assert sml.shape == (N, H, W)
    assert jnp.allclose(logits, ref_logits, atol=1e-4, rtol=1e-4)
    assert jnp.allclose(sml, ref_sml, atol=1e-4, rtol=1e-4)

    print("KERNEL_OK")
</pallas_src>

<mosaic_0001>
module attributes {stable_mosaic.version = 11 : i64} {
  func.func @deeplab_sml_kernel(%arg0: i32, %arg1: memref<256x4xbf16, #tpu.memory_space<vmem>>, %arg2: memref<4x40xbf16, #tpu.memory_space<vmem>>, %arg3: memref<40x4xbf16, #tpu.memory_space<vmem>>, %arg4: memref<1x40xf32, #tpu.memory_space<vmem>>, %arg5: memref<40x1xf32, #tpu.memory_space<vmem>>, %arg6: memref<40x1xf32, #tpu.memory_space<vmem>>, %arg7: memref<40x1xf32, #tpu.memory_space<vmem>>, %arg8: memref<256x40xf32, #tpu.memory_space<vmem>>, %arg9: memref<1x1x256xf32, #tpu.memory_space<vmem>>) attributes {dimension_semantics = [#tpu.dimension_semantics<parallel>], iteration_bounds = array<i64: 2>, scalar_prefetch = 0 : i64, scratch_operands = 0 : i64, tpu.core_type = #tpu.core_type<tc>, window_params = [{transform_indices = @transform_0, window_bounds = array<i64: 256, 4>}, {pipeline_mode = #tpu.pipeline_mode<synchronous>, transform_indices = @transform_1, window_bounds = array<i64: 4, 40>}, {pipeline_mode = #tpu.pipeline_mode<synchronous>, transform_indices = @transform_2, window_bounds = array<i64: 40, 4>}, {pipeline_mode = #tpu.pipeline_mode<synchronous>, transform_indices = @transform_3, window_bounds = array<i64: 1, 40>}, {pipeline_mode = #tpu.pipeline_mode<synchronous>, transform_indices = @transform_4, window_bounds = array<i64: 40, 1>}, {pipeline_mode = #tpu.pipeline_mode<synchronous>, transform_indices = @transform_5, window_bounds = array<i64: 40, 1>}, {pipeline_mode = #tpu.pipeline_mode<synchronous>, transform_indices = @transform_6, window_bounds = array<i64: 40, 1>}, {transform_indices = @transform_7, window_bounds = array<i64: 256, 40>}, {transform_indices = @transform_8, window_bounds = array<i64: 1, 1, 256>}]} {
    %c0 = arith.constant 0 : index
    %c0_0 = arith.constant 0 : index
    %0 = vector.load %arg1[%c0, %c0_0] : memref<256x4xbf16, #tpu.memory_space<vmem>>, vector<256x4xbf16>
    %c0_1 = arith.constant 0 : index
    %c0_2 = arith.constant 0 : index
    %1 = vector.load %arg2[%c0_1, %c0_2] : memref<4x40xbf16, #tpu.memory_space<vmem>>, vector<4x40xbf16>
    %cst = arith.constant dense<0.000000e+00> : vector<256x40xf32>
    %2 = tpu.matmul %0, %1, %cst {dimension_numbers = #tpu.dot_dimension_numbers<[1], [0], [0], [1], [0, 0, 1, 1], [], []>} : vector<256x4xbf16>, vector<4x40xbf16>, vector<256x40xf32> -> vector<256x40xf32>
    %c0_3 = arith.constant 0 : index
    %c0_4 = arith.constant 0 : index
    %3 = vector.load %arg4[%c0_3, %c0_4] : memref<1x40xf32, #tpu.memory_space<vmem>>, vector<1x40xf32>
    %4 = vector.broadcast %3 : vector<1x40xf32> to vector<256x40xf32>
    %5 = arith.addf %2, %4 : vector<256x40xf32>
    %c0_5 = arith.constant 0 : index
    %c0_6 = arith.constant 0 : index
    %6 = vector.load %arg8[%c0_5, %c0_6] : memref<256x40xf32, #tpu.memory_space<vmem>>, vector<256x40xf32>
    tpu.vector_store %arg8[%c0_5, %c0_6], %5 {strides = array<i32>} : memref<256x40xf32, #tpu.memory_space<vmem>>, vector<256x40xf32>,
    %c0_7 = arith.constant 0 : index
    %c0_8 = arith.constant 0 : index
    %7 = vector.load %arg3[%c0_7, %c0_8] : memref<40x4xbf16, #tpu.memory_space<vmem>>, vector<40x4xbf16>
    %cst_9 = arith.constant dense<0.000000e+00> : vector<40x256xf32>
    %8 = tpu.matmul %7, %0, %cst_9 {dimension_numbers = #tpu.dot_dimension_numbers<[1], [1], [0], [0], [0, 0, 1, 0], [], []>} : vector<40x4xbf16>, vector<256x4xbf16>, vector<40x256xf32> -> vector<40x256xf32>
    %c0_10 = arith.constant 0 : index
    %c0_11 = arith.constant 0 : index
    %9 = vector.load %arg5[%c0_10, %c0_11] : memref<40x1xf32, #tpu.memory_space<vmem>>, vector<40x1xf32>
    %10 = vector.broadcast %9 : vector<40x1xf32> to vector<40x256xf32>
    %11 = arith.addf %8, %10 : vector<40x256xf32>
    %cst_12 = arith.constant dense<0xFF800000> : vector<256xf32>
    %12 = vector.multi_reduction <maximumf>, %11, %cst_12 [0] : vector<40x256xf32> to vector<256xf32>
    %13 = vector.shape_cast %12 : vector<256xf32> to vector<1x256xf32>
    %14 = tpu.iota {dimensions = array<i32: 0>} : vector<40x256xi32>
    %15 = vector.broadcast %13 : vector<1x256xf32> to vector<40x256xf32>
    %16 = arith.cmpf oeq, %11, %15 : vector<40x256xf32>
    %c40_i32 = arith.constant 40 : i32
    %17 = vector.broadcast %c40_i32 : i32 to vector<40x256xi32>
    %18 = arith.select %16, %14, %17 : vector<40x256xi1>, vector<40x256xi32>
    %cst_13 = arith.constant dense<2147483647> : vector<256xi32>
    %19 = vector.multi_reduction <minsi>, %18, %cst_13 [0] : vector<40x256xi32> to vector<256xi32>
    %20 = vector.shape_cast %19 : vector<256xi32> to vector<1x256xi32>
    %21 = vector.broadcast %20 : vector<1x256xi32> to vector<40x256xi32>
    %22 = arith.cmpi eq, %14, %21 : vector<40x256xi32>
    %c0_14 = arith.constant 0 : index
    %c0_15 = arith.constant 0 : index
    %23 = vector.load %arg6[%c0_14, %c0_15] : memref<40x1xf32, #tpu.memory_space<vmem>>, vector<40x1xf32>
    %cst_16 = arith.constant 0.000000e+00 : f32
    %24 = vector.shape_cast %23 : vector<40x1xf32> to vector<40x1xf32>
    %25 = vector.broadcast %24 : vector<40x1xf32> to vector<40x256xf32>
    %26 = vector.broadcast %cst_16 : f32 to vector<40x256xf32>
    %27 = arith.select %22, %25, %26 : vector<40x256xi1>, vector<40x256xf32>
    %cst_17 = arith.constant dense<0.000000e+00> : vector<256xf32>
    %28 = vector.multi_reduction <add>, %27, %cst_17 [0] : vector<40x256xf32> to vector<256xf32>
    %29 = vector.shape_cast %28 : vector<256xf32> to vector<1x256xf32>
    %c0_18 = arith.constant 0 : index
    %c0_19 = arith.constant 0 : index
    %30 = vector.load %arg7[%c0_18, %c0_19] : memref<40x1xf32, #tpu.memory_space<vmem>>, vector<40x1xf32>
    %cst_20 = arith.constant 0.000000e+00 : f32
    %31 = vector.shape_cast %30 : vector<40x1xf32> to vector<40x1xf32>
    %32 = vector.broadcast %31 : vector<40x1xf32> to vector<40x256xf32>
    %33 = vector.broadcast %cst_20 : f32 to vector<40x256xf32>
    %34 = arith.select %22, %32, %33 : vector<40x256xi1>, vector<40x256xf32>
    %cst_21 = arith.constant dense<0.000000e+00> : vector<256xf32>
    %35 = vector.multi_reduction <add>, %34, %cst_21 [0] : vector<40x256xf32> to vector<256xf32>
    %36 = vector.shape_cast %35 : vector<256xf32> to vector<1x256xf32>
    %37 = arith.subf %29, %13 : vector<1x256xf32>
    %38 = arith.mulf %37, %36 : vector<1x256xf32>
    %39 = vector.shape_cast %38 : vector<1x256xf32> to vector<1x1x256xf32>
    %c0_22 = arith.constant 0 : index
    %c0_23 = arith.constant 0 : index
    %c0_24 = arith.constant 0 : index
    %40 = vector.load %arg9[%c0_22, %c0_23, %c0_24] : memref<1x1x256xf32, #tpu.memory_space<vmem>>, vector<1x1x256xf32>
    tpu.vector_store %arg9[%c0_22, %c0_23, %c0_24], %39 {strides = array<i32>} : memref<1x1x256xf32, #tpu.memory_space<vmem>>, vector<1x1x256xf32>,
    return
  }
  func.func @transform_0(%arg0: i32) -> (i32, i32) {
    %c0_i32 = arith.constant 0 : i32
    %c0_i32_0 = arith.constant 0 : i32
    return %arg0, %c0_i32 : i32, i32
  }
  func.func @transform_1(%arg0: i32) -> (i32, i32) {
    %c0_i32 = arith.constant 0 : i32
    %c0_i32_0 = arith.constant 0 : i32
    %c0_i32_1 = arith.constant 0 : i32
    return %c0_i32, %c0_i32_0 : i32, i32
  }
  func.func @transform_2(%arg0: i32) -> (i32, i32) {
    %c0_i32 = arith.constant 0 : i32
    %c0_i32_0 = arith.constant 0 : i32
    %c0_i32_1 = arith.constant 0 : i32
    return %c0_i32, %c0_i32_0 : i32, i32
  }
  func.func @transform_3(%arg0: i32) -> (i32, i32) {
    %c0_i32 = arith.constant 0 : i32
    %c0_i32_0 = arith.constant 0 : i32
    %c0_i32_1 = arith.constant 0 : i32
    return %c0_i32, %c0_i32_0 : i32, i32
  }
  func.func @transform_4(%arg0: i32) -> (i32, i32) {
    %c0_i32 = arith.constant 0 : i32
    %c0_i32_0 = arith.constant 0 : i32
    %c0_i32_1 = arith.constant 0 : i32
    return %c0_i32, %c0_i32_0 : i32, i32
  }
  func.func @transform_5(%arg0: i32) -> (i32, i32) {
    %c0_i32 = arith.constant 0 : i32
    %c0_i32_0 = arith.constant 0 : i32
    %c0_i32_1 = arith.constant 0 : i32
    return %c0_i32, %c0_i32_0 : i32, i32
  }
  func.func @transform_6(%arg0: i32) -> (i32, i32) {
    %c0_i32 = arith.constant 0 : i32
    %c0_i32_0 = arith.constant 0 : i32
    %c0_i32_1 = arith.constant 0 : i32
    return %c0_i32, %c0_i32_0 : i32, i32
  }
  func.func @transform_7(%arg0: i32) -> (i32, i32) {
    %c0_i32 = arith.constant 0 : i32
    %c0_i32_0 = arith.constant 0 : i32
    return %arg0, %c0_i32 : i32, i32
  }
  func.func @transform_8(%arg0: i32) -> (i32, i32, i32) {
    %c0_i32 = arith.constant 0 : i32
    %c0_i32_0 = arith.constant 0 : i32
    %c0_i32_1 = arith.constant 0 : i32
    return %arg0, %c0_i32, %c0_i32_0 : i32, i32, i32
  }
}

</mosaic_0001>

<bundles_post_ra>
// kernel: tpu_custom_call.1
= control target key start
LH: loop header
LB: loop body
LE: loop exit
PB: predicated region body
PF: predicated region fallthrough
CT: control target
= control target key end

     0   :  { %14 = vsyncpa [#allocation3], 0  ;;  %s1907_s0 = inlined_call_operand.vmem [shape: bf16[512,4], index: 0, kind: input, shape index: {}]   ;;  %s1908_s1 = inlined_call_operand.vmem [shape: bf16[4,40], index: 1, kind: input, shape index: {}]   ;;  %s1909_s2 = inlined_call_operand.vmem [shape: bf16[40,4], index: 2, kind: input, shape index: {}]   ;;  %s1910_s3 = inlined_call_operand.vmem [shape: f32[1,40], index: 3, kind: input, shape index: {}]   ;;  %s1911_s4 = inlined_call_operand.vmem [shape: f32[40,1], index: 4, kind: input, shape index: {}]   ;;  %s1912_s5 = inlined_call_operand.vmem [shape: f32[40,1], index: 5, kind: input, shape index: {}]   ;;  %s1913_s6 = inlined_call_operand.vmem [shape: f32[40,1], index: 6, kind: input, shape index: {}]   ;;  %s1914_s7 = inlined_call_operand.vmem [shape: f32[512,40], index: 7, kind: output, shape index: {0}]   ;;  %s1915_s8 = inlined_call_operand.hbm [shape: f32[2,1,256], index: 8, kind: output, shape index: {1}]  }
   0x1   :  { %16 = vsyncpa [#allocation3 + $0x1], 0  ;;  %s1483_s27 = smov 0   ;;  %s1485_s28 = smov 0  }
   0x2   :  { %s1487_s29 = smov 0   ;;  %s1489_s30 = smov 0  }
   0x3 LB: > { %s1150_s9 = sadd.s32 4294967295, %s1433_s30   ;;  %s1151_s10 = sadd.s32 4294967294, %s1433_s30   ;;  %s1433_s30 = sphi %s1489_s30, %s1921_s30   ;;  %s1429_s29 = sphi %s1487_s29, %s1920_s29   ;;  %s1425_s28 = sphi %s1485_s28, %s1919_s28   ;;  %s1421_s27 = sphi %s1483_s27, %s1918_s27  }
   0x4   : > { %s1506_s11 = sadd.s32 1, %s1433_s30   ;;  %s207_s12 = sadd.s32 1, %s1429_s29 }
   0x5   : > { %s204_s13 = ssub.s32 %s1433_s30, %s1506_s11  ;;  %p217_p0 = scmp.ne.s32.totalorder %s1429_s29, %s1425_s28 }
   0x6   : > { %p205_p1 = scmp.eq.s32.totalorder %s204_s13, 0  ;;  %p218_p2 = scmp.eq.s32.totalorder %s1150_s9, 1 }
   0x7   : > { %p223_p3 = scmp.ne.s32.totalorder %s1425_s28, %s1421_s27  ;;  %p224_p4 = scmp.eq.s32.totalorder %s1151_s10, 1 }
   0x8   : > { %s1516_s14 = scalar_select %p205_p1, %s1429_s29, %s207_s12  }
   0x9   : > { %p1518_p5 = por %p218_p2, %p217_p0  ;;  %p1522_p6 = por %p224_p4, %p223_p3 }
   0xa   : > { %p1154_p7 = scmp.ge.s32.totalorder %s1433_s30, 1  ;;  %p269_p8 = scmp.lt.s32.totalorder %s1433_s30, 3 }
   0xc   : > { %p270_p9 = pnand %p1154_p7, %p269_p8 }
   0xd   : > { %s1531_s19 = sshll.u32 (!%p270_p9), %s1150_s9, 5  ;;  %s1437_s10 = smov (!%p270_p9), [#allocation2]  }
   0xe   : > { %273 = sbr.rel (%p270_p9) target bundleno = 381 (0x17d), region = 48  ;;  %p309_p10 = scmp.lt.s32.totalorder (!%p270_p9), %s1531_s19, 63 }
   0xf   : > { %s1065_s25 = scalar_lea.hbm (!%p270_p9), %s1915_s8, %s1531_s19  ;;  %s1377_s12 = sshll.u32 (!%p270_p9), %s1437_s10, 4  ;;  %s1378_s12 = int_to_ptr.vmem [resolvable:$false] %s1377_s12 }
  0x10   : > { %s1379_s13 = scalar_lea.vmem (!%p270_p9), %s1378_s12, 64 }
  0x13   : > { %v353_v0 = vld [vmem:[%s1908_s1] sm:$0x3]  ;;  %vm490_vm0 = vcmask 1041408   ;;  %vm441_vm1 = vcmask 31744   ;;  %v1536_v1 = vld [vmem:[%s1909_s2 + $0x8] sm:$0xff]   ;;  %s1542_s22 = scalar_select %p309_p10, %s1531_s19, 63 }
  0x14   : > { %1294 = vmatprep.subr.msk.bf16.mxu0 %vm490_vm0, %v353_v0  ;;  %v492_v2 = vsel %vm490_vm0, %v353_v0, 0  ;;  %1240 = vmatprep.mubr.msk.bf16.mxu1 %vm441_vm1, %v1536_v1  ;;  %v1435_v3 = vmov 0   ;;  %v693_v4 = vld [vmem:[%s1911_s4] sm:$0xff]  ;;  %v694_v5 = vld [vmem:[%s1911_s4 + $0x8] sm:$0xff]  ;;  %v695_v6 = vld [vmem:[%s1911_s4 + $0x10] sm:$0xff]  ;;  %vm655_vm2 = vcmask 326656  }
  0x15   : > { %1245 = vmatpush3.bf16.msra.mxu0 %v492_v2  ;;  %1352 = vset.pattern.permute.xlu0 %v1435_v3  ;;  %s1157_s9 = sshll.u32 %s1542_s22, 2  ;;  %v696_v7 = vld [vmem:[%s1911_s4 + $0x18] sm:$0xff]  ;;  %v697_v9 = vld [vmem:[%s1911_s4 + $0x20] sm:$0xff]  ;;  %v897_v17 = vld [vmem:[%s1912_s5 + $0x8] sm:$0xff]  ;;  %s1159_s26 = sshll.u32 %s1542_s22, 3 }
  0x16   : > { %1353 = vset.pattern.permute.xlu1 %v1435_v3  ;;  %700 = vperm.xlu0 %1352, %v693_v4   ;;  %s1557_s18 = scalar_lea.vmem %s1907_s0, %s1157_s9  ;;  %v896_v13 = vld [vmem:[%s1912_s5] sm:$0xff]  ;;  %v898_v19 = vld [vmem:[%s1912_s5 + $0x10] sm:$0xff]  ;;  %v899_v25 = vld [vmem:[%s1912_s5 + $0x18] sm:$0xff]  ;;  %s1694_s17 = scalar_lea.vmem %s1914_s7, %s1159_s26 }
  0x17   : > { %705 = vperm.xlu1 %1353, %v694_v5   ;;  %v1563_v8 = vld [vmem:[%s1557_s18] sm:$0xff]   ;;  %v1569_v10 = vld [vmem:[%s1557_s18 + $0x78] sm:$0xff]   ;;  %v1574_v11 = vld [vmem:[%s1557_s18 + $0x8] sm:$0xff]   ;;  %s305_s22 = sand.u32 1, %s1425_s28  }
  0x18   : > { %1246 = vmatprep.mubr.msk.bf16.mxu0 %vm441_vm1, %v1563_v8  ;;  %1296 = vmatprep.subr.msk.bf16.mxu1 %vm441_vm1, %v1569_v10  ;;  %v1357_v12 = vld [vmem:[%s1557_s18 + $0x38] sm:$0xff]   ;;  %v1587_v14 = vld [vmem:[%s1557_s18 + $0x10] sm:$0xff]   ;;  %v1362_v21 = vld [vmem:[%s1557_s18 + $0x20] sm:$0xff]   ;;  %v446_v41 = vsel %vm441_vm1, %v1574_v11, 0  ;;  %v443_v43 = vsel %vm441_vm1, %v1563_v8, 0  ;;  %s1155_s20 = sshll.u32 %s305_s22, 1 }
  0x19   : > { %1295 = vmatprep.subr.msk.bf16.mxu0 %vm441_vm1, %v1569_v10  ;;  %1247 = vmatmul.mubr.msk.bf16.vlgmr.msra.gmra.mxu0 %vm441_vm1, %v1574_v11  ;;  %v464_v15 = vsel %vm441_vm1, %v1357_v12, 0  ;;  %v1591_v16 = vld [vmem:[%s1557_s18 + $0x70] sm:$0xff]   ;;  %v1360_v20 = vld [vmem:[%s1557_s18 + $0x18] sm:$0xff]   ;;  %v956_v22 = vld [vmem:[%s1913_s6] sm:$0xff]  ;;  %v455_v35 = vsel %vm441_vm1, %v1362_v21, 0  ;;  %v449_v40 = vsel %vm441_vm1, %v1587_v14, 0 }
  0x1a   : > { %710 = vperm.xlu0 %1352, %v695_v6   ;;  %1286 = vmatpush3.bf16.xpose.msra.mxu1 %v464_v15  ;;  %v1361_v18 = vld [vmem:[%s1557_s18 + $0x30] sm:$0xff]   ;;  %v1363_v24 = vld [vmem:[%s1557_s18 + $0x68] sm:$0xff]   ;;  %v900_v28 = vld [vmem:[%s1912_s5 + $0x20] sm:$0xff]  ;;  %v452_v39 = vsel %vm441_vm1, %v1360_v20, 0  ;;  %s307_s21 = scalar_lea.vmem [#allocation2], %s1155_s20  ;;  %s1049_s26 = scalar_lea.sflag [#allocation3], %s305_s22 }
  0x1b   : > { %715 = vperm.xlu1 %1353, %v696_v7   ;;  %1223 = vmatpush3.bf16.xpose.msra.mxu0 %v464_v15  ;;  %v461_v23 = vsel %vm441_vm1, %v1361_v18, 0  ;;  %v1364_v26 = vld [vmem:[%s1557_s18 + $0x28] sm:$0xff]   ;;  %v1365_v30 = vld [vmem:[%s1557_s18 + $0x60] sm:$0xff]   ;;  %v958_v31 = vld [vmem:[%s1913_s6 + $0x10] sm:$0xff] }
  0x1c   : > { %1250 = vmatprep.mubr.msk.bf16.mxu0 %vm441_vm1, %v1587_v14  ;;  %1298 = vmatprep.subr.msk.bf16.mxu1 %vm441_vm1, %v1591_v16  ;;  %v957_v27 = vld [vmem:[%s1913_s6 + $0x8] sm:$0xff]  ;;  %v458_v29 = vsel %vm441_vm1, %v1364_v26, 0  ;;  %v960_v32 = vld [vmem:[%s1913_s6 + $0x20] sm:$0xff]  ;;  %v959_v34 = vld [vmem:[%s1913_s6 + $0x18] sm:$0xff] }
  0x1d   : > { %1297 = vmatprep.subr.msk.bf16.mxu0 %vm441_vm1, %v1591_v16  ;;  %v1366_v33 = vld [vmem:[%s1557_s18 + $0x40] sm:$0xff]   ;;  %v1367_v36 = vld [vmem:[%s1557_s18 + $0x58] sm:$0xff]   ;;  %v1368_v37 = vld [vmem:[%s1557_s18 + $0x48] sm:$0xff]  }
  0x1e   : > { %720 = vperm.xlu0 %1352, %v697_v9   ;;  %v1369_v38 = vld [vmem:[%s1557_s18 + $0x50] sm:$0xff]   ;;  %v1371_v42 = vld [vmem:[%s1909_s2] sm:$0xff]   ;;  %s1067_s18 = sshll.u32 %s307_s21, 4  ;;  %s1068_s18 = int_to_ptr.vmem [resolvable:$true] %s1067_s18 }
  0x1f   : > { %903 = vperm.xlu1 %1353, %v896_v13   ;;  %v1372_v44 = vld [vmem:[%s1909_s2 + $0x10] ss:$0 sps:$4 sm:$0xff]   ;;  %v1689_v45 = vld [vmem:[%s1910_s3] ss:$0 sm:$0xff]  ;;  %s1373_s9 = scalar_lea.vmem %s1068_s18, 32  ;;  %p1380_p0 = scmp.lt.s32.totalorder %s1068_s18, %s1378_s12 }
  0x20   : > { %p1374_p11 = scmp.ne.s32.totalorder %s1068_s18, %s1373_s9  ;;  %p1381_p1 = scmp.lt.s32.totalorder %s1379_s13, %s1373_s9 }
  0x21   : > { %1251 = vmatmul.mubr.msk.bf16.gmra.mxu0 %vm441_vm1, %v1360_v20 }
  0x22   : > { %908 = vperm.xlu0 %1352, %v897_v17   ;;  %1254 = vmatprep.mubr.msk.bf16.mxu0 %vm441_vm1, %v1362_v21  ;;  %p1375_p12 = pnand %p1374_p11, %p1518_p5  ;;  %p1382_p2 = por %p1381_p1, %p1380_p0 }
  0x23   : > { %913 = vperm.xlu1 %1353, %v898_v19   ;;  %1287 = vmatpush3.bf16.xpose.msra.mxu1 %v461_v23 }
  0x24   : > { %1225 = vmatpush3.bf16.xpose.msra.mxu0 %v461_v23  ;;  %1300 = vmatprep.subr.msk.bf16.mxu1 %vm441_vm1, %v1363_v24  ;;  %p1376_p13 = pneg %p1375_p12 }
  0x25   : > { %1299 = vmatprep.subr.msk.bf16.mxu0 %vm441_vm1, %v1363_v24 }
  0x26   : > { %963 = vperm.xlu0 %1352, %v956_v22   ;;  %p1383_p3 = pnand %p1382_p2, %p1376_p13 }
  0x27   : > { %968 = vperm.xlu1 %1353, %v957_v27  }
  0x29   : > { %1255 = vmatmul.mubr.msk.bf16.gmra.mxu0 %vm441_vm1, %v1364_v26 }
  0x2a   : > { %918 = vperm.xlu0 %1352, %v899_v25   ;;  %1258 = vmatprep.mubr.msk.bf16.mxu0 %vm441_vm1, %v1361_v18 }
  0x2b   : > { %1288 = vmatpush3.bf16.xpose.msra.mxu1 %v458_v29  ;;  %973 = vperm.xlu1 %1353, %v958_v31  }
  0x2c   : > { %1227 = vmatpush3.bf16.xpose.msra.mxu0 %v458_v29  ;;  %1302 = vmatprep.subr.msk.bf16.mxu1 %vm441_vm1, %v1365_v30 }
  0x2d   : > { %1301 = vmatprep.subr.msk.bf16.mxu0 %vm441_vm1, %v1365_v30 }
  0x2e   : > { %923 = vperm.xlu0 %1352, %v900_v28  }
  0x2f   : > { %978 = vperm.xlu1 %1353, %v959_v34  }
  0x31   : > { %1259 = vmatmul.mubr.msk.bf16.gmra.mxu0 %vm441_vm1, %v1357_v12 }
  0x32   : > { %983 = vperm.xlu0 %1352, %v960_v32   ;;  %1262 = vmatprep.mubr.msk.bf16.mxu0 %vm441_vm1, %v1366_v33 }
  0x33   : > { %1289 = vmatpush3.bf16.xpose.msra.mxu1 %v455_v35 }
  0x34   : > { %1229 = vmatpush3.bf16.xpose.msra.mxu0 %v455_v35  ;;  %1304 = vmatprep.subr.msk.bf16.mxu1 %vm441_vm1, %v1367_v36 }
  0x35   : > { %1303 = vmatprep.subr.msk.bf16.mxu0 %vm441_vm1, %v1367_v36 }
  0x39   : > { %1263 = vmatmul.mubr.msk.bf16.gmra.mxu0 %vm441_vm1, %v1368_v37 }
  0x3a   : > { %1266 = vmatprep.mubr.msk.bf16.mxu0 %vm441_vm1, %v1369_v38 }
  0x3b   : > { %1290 = vmatpush3.bf16.xpose.msra.mxu1 %v452_v39 }
  0x3c   : > { %1231 = vmatpush3.bf16.xpose.msra.mxu0 %v452_v39  ;;  %1306 = vmatprep.subr.msk.bf16.mxu1 %vm441_vm1, %v1369_v38 }
  0x3d   : > { %1305 = vmatprep.subr.msk.bf16.mxu0 %vm441_vm1, %v1369_v38 }
  0x41   : > { %1267 = vmatmul.mubr.msk.bf16.gmra.mxu0 %vm441_vm1, %v1367_v36 }
  0x42   : > { %1270 = vmatprep.mubr.msk.bf16.mxu0 %vm441_vm1, %v1365_v30 }
  0x43   : > { %1291 = vmatpush3.bf16.xpose.msra.mxu1 %v449_v40 }
  0x44   : > { %1233 = vmatpush3.bf16.xpose.msra.mxu0 %v449_v40  ;;  %1308 = vmatprep.subr.msk.bf16.mxu1 %vm441_vm1, %v1368_v37 }
  0x45   : > { %1307 = vmatprep.subr.msk.bf16.mxu0 %vm441_vm1, %v1368_v37 }
  0x49   : > { %1271 = vmatmul.mubr.msk.bf16.gmra.mxu0 %vm441_vm1, %v1363_v24 }
  0x4a   : > { %1274 = vmatprep.mubr.msk.bf16.mxu0 %vm441_vm1, %v1591_v16 }
  0x4b   : > { %1292 = vmatpush3.bf16.xpose.msra.mxu1 %v446_v41 }
  0x4c   : > { %1235 = vmatpush3.bf16.xpose.msra.mxu0 %v446_v41  ;;  %1310 = vmatprep.subr.msk.bf16.mxu1 %vm441_vm1, %v1366_v33 }
  0x4d   : > { %1309 = vmatprep.subr.msk.bf16.mxu0 %vm441_vm1, %v1366_v33 }
  0x51   : > { %1275 = vmatmul.mubr.msk.bf16.gmra.mxu0 %vm441_vm1, %v1569_v10 }
  0x52   : > { %1238 = vmatprep.mubr.msk.bf16.mxu0 %vm441_vm1, %v1371_v42 }
  0x53   : > { %1293 = vmatpush3.bf16.xpose.msra.mxu1 %v443_v43 }
  0x54   : > { %1237 = vmatpush3.bf16.xpose.msra.mxu0 %v443_v43 }
  0x5a   : > { %1241 = vmatmul.mubr.msk.bf16.vlgmr.msra.gmra.mxu1 %vm441_vm1, %v1536_v1 }
  0x5b   : > { %1239 = vmatmul.mubr.msk.bf16.vlgmr.msra.gmra.mxu0 %vm441_vm1, %v1371_v42  ;;  %1242 = vmatprep.mubr.msk.bf16.mxu1 %vm441_vm1, %v1372_v44 }
  0x62   : > { %1243 = vmatmul.mubr.msk.bf16.gmra.mxu1 %vm441_vm1, %v1372_v44 }
  0x91   : > { %v701_v42 = vpop.permute.xlu0 %700 }
  0xd9   : > { %v1248_v46 = vpop.f32.mrf.mxu0 }
  0xda   : > { %v537_v47 = vadd.f32 %v1248_v46, %v1689_v45 }
  0xdb   : > { %v528_v48 = vpop.f32.mrf.mxu0 }
  0xdc   : > { %658 = vst.msk [vmem:[%s1694_s17 + $0x10] sm:$0xff] %vm655_vm2, %v537_v47  ;;  %v529_v49 = vadd.f32 %v1689_v45, %v528_v48  ;;  %v706_v48 = vpop.permute.xlu1 %705 }
  0xdd   : > { %v1249_v50 = vpop.f32.mrf.mxu0 }
  0xde   : > { %656 = vst.msk [vmem:[%s1694_s17] sm:$0xff] %vm655_vm2, %v529_v49  ;;  %v540_v51 = vadd.f32 %v1249_v50, %v1689_v45 }
  0xdf   : > { %v531_v52 = vpop.f32.mrf.mxu0 }
  0xe0   : > { %659 = vst.msk [vmem:[%s1694_s17 + $0x18] sm:$0xff] %vm655_vm2, %v540_v51  ;;  %v532_v53 = vadd.f32 %v1689_v45, %v531_v52  ;;  %v711_v51 = vpop.permute.xlu0 %710 }
  0xe1   : > { %v1252_v54 = vpop.f32.mrf.mxu0 }
  0xe2   : > { %657 = vst.msk [vmem:[%s1694_s17 + $0x8] sm:$0xff] %vm655_vm2, %v532_v53  ;;  %v553_v55 = vadd.f32 %v1252_v54, %v1689_v45 }
  0xe3   : > { %v544_v56 = vpop.f32.mrf.mxu0 }
  0xe4   : > { %662 = vst.msk [vmem:[%s1694_s17 + $0x30] sm:$0xff] %vm655_vm2, %v553_v55  ;;  %v545_v57 = vadd.f32 %v1689_v45, %v544_v56  ;;  %v716_v56 = vpop.permute.xlu1 %715 }
  0xe5   : > { %v1253_v58 = vpop.f32.mrf.mxu0 }
  0xe6   : > { %660 = vst.msk [vmem:[%s1694_s17 + $0x20] sm:$0xff] %vm655_vm2, %v545_v57  ;;  %v556_v59 = vadd.f32 %v1253_v58, %v1689_v45 }
  0xe7   : > { %v547_v60 = vpop.f32.mrf.mxu0 }
  0xe8   : > { %663 = vst.msk [vmem:[%s1694_s17 + $0x38] sm:$0xff] %vm655_vm2, %v556_v59  ;;  %v548_v61 = vadd.f32 %v1689_v45, %v547_v60 }
  0xe9   : > { %v1256_v62 = vpop.f32.mrf.mxu0 }
  0xea   : > { %661 = vst.msk [vmem:[%s1694_s17 + $0x28] sm:$0xff] %vm655_vm2, %v548_v61  ;;  %v569_v63 = vadd.f32 %v1256_v62, %v1689_v45 }
  0xeb   : > { %v560_v0 = vpop.f32.mrf.mxu0 }
  0xec   : > { %666 = vst.msk [vmem:[%s1694_s17 + $0x50] sm:$0xff] %vm655_vm2, %v569_v63  ;;  %v561_v1 = vadd.f32 %v1689_v45, %v560_v0  ;;  %v721_v0 = vpop.permute.xlu0 %720 }
  0xed   : > { %v1257_v2 = vpop.f32.mrf.mxu0 }
  0xee   : > { %664 = vst.msk [vmem:[%s1694_s17 + $0x40] sm:$0xff] %vm655_vm2, %v561_v1  ;;  %v572_v3 = vadd.f32 %v1257_v2, %v1689_v45 }
  0xef   : > { %v563_v4 = vpop.f32.mrf.mxu0 }
  0xf0   : > { %667 = vst.msk [vmem:[%s1694_s17 + $0x58] sm:$0xff] %vm655_vm2, %v572_v3  ;;  %v564_v5 = vadd.f32 %v1689_v45, %v563_v4 }
  0xf1   : > { %v1260_v6 = vpop.f32.mrf.mxu0 }
  0xf2   : > { %665 = vst.msk [vmem:[%s1694_s17 + $0x48] sm:$0xff] %vm655_vm2, %v564_v5  ;;  %v585_v7 = vadd.f32 %v1260_v6, %v1689_v45 }
  0xf3   : > { %v576_v8 = vpop.f32.mrf.mxu0 }
  0xf4   : > { %670 = vst.msk [vmem:[%s1694_s17 + $0x70] sm:$0xff] %vm655_vm2, %v585_v7  ;;  %v577_v9 = vadd.f32 %v1689_v45, %v576_v8 }
  0xf5   : > { %v1261_v10 = vpop.f32.mrf.mxu0 }
  0xf6   : > { %668 = vst.msk [vmem:[%s1694_s17 + $0x60] sm:$0xff] %vm655_vm2, %v577_v9  ;;  %v588_v11 = vadd.f32 %v1261_v10, %v1689_v45 }
  0xf7   : > { %v579_v12 = vpop.f32.mrf.mxu0 }
  0xf8   : > { %671 = vst.msk [vmem:[%s1694_s17 + $0x78] sm:$0xff] %vm655_vm2, %v588_v11  ;;  %v580_v13 = vadd.f32 %v1689_v45, %v579_v12 }
  0xf9   : > { %v1264_v14 = vpop.f32.mrf.mxu0 }
  0xfa   : > { %669 = vst.msk [vmem:[%s1694_s17 + $0x68] sm:$0xff] %vm655_vm2, %v580_v13  ;;  %v601_v15 = vadd.f32 %v1264_v14, %v1689_v45 }
  0xfb   : > { %v592_v16 = vpop.f32.mrf.mxu0 }
  0xfc   : > { %674 = vst.msk [vmem:[%s1694_s17 + $0x90] sm:$0xff] %vm655_vm2, %v601_v15  ;;  %v593_v17 = vadd.f32 %v1689_v45, %v592_v16 }
  0xfd   : > { %v1265_v18 = vpop.f32.mrf.mxu0 }
  0xfe   : > { %672 = vst.msk [vmem:[%s1694_s17 + $0x80] sm:$0xff] %vm655_vm2, %v593_v17  ;;  %v604_v19 = vadd.f32 %v1265_v18, %v1689_v45  ;;  %v826_v18 = vlaneseq }
  0xff   : > { %v595_v20 = vpop.f32.mrf.mxu0 }
 0x100   : > { %675 = vst.msk [vmem:[%s1694_s17 + $0x98] sm:$0xff] %vm655_vm2, %v604_v19  ;;  %v596_v21 = vadd.f32 %v1689_v45, %v595_v20 }
 0x101   : > { %v1268_v22 = vpop.f32.mrf.mxu0 }
 0x102   : > { %673 = vst.msk [vmem:[%s1694_s17 + $0x88] sm:$0xff] %vm655_vm2, %v596_v21  ;;  %v617_v23 = vadd.f32 %v1268_v22, %v1689_v45 }
 0x103   : > { %v608_v24 = vpop.f32.mrf.mxu0 }
 0x104   : > { %678 = vst.msk [vmem:[%s1694_s17 + $0xb0] sm:$0xff] %vm655_vm2, %v617_v23  ;;  %v609_v25 = vadd.f32 %v1689_v45, %v608_v24  ;;  %v1799_v23 = vshrl.u32 %v826_v18, 7 }
 0x105   : > { %v1269_v26 = vpop.f32.mrf.mxu0 }
 0x106   : > { %676 = vst.msk [vmem:[%s1694_s17 + $0xa0] sm:$0xff] %vm655_vm2, %v609_v25  ;;  %v620_v27 = vadd.f32 %v1269_v26, %v1689_v45 }
 0x107   : > { %v611_v28 = vpop.f32.mrf.mxu0 }
 0x108   : > { %679 = vst.msk [vmem:[%s1694_s17 + $0xb8] sm:$0xff] %vm655_vm2, %v620_v27  ;;  %v612_v29 = vadd.f32 %v1689_v45, %v611_v28  ;;  %v1802_v28 = vadd.s32 8, %v1799_v23 }
 0x109   : > { %v1272_v30 = vpop.f32.mrf.mxu0 }
 0x10a   : > { %677 = vst.msk [vmem:[%s1694_s17 + $0xa8] sm:$0xff] %vm655_vm2, %v612_v29  ;;  %v633_v31 = vadd.f32 %v1272_v30, %v1689_v45  ;;  %v1805_v29 = vadd.s32 16, %v1799_v23 }
 0x10b   : > { %v624_v32 = vpop.f32.mrf.mxu0 }
 0x10c   : > { %682 = vst.msk [vmem:[%s1694_s17 + $0xd0] sm:$0xff] %vm655_vm2, %v633_v31  ;;  %v625_v33 = vadd.f32 %v1689_v45, %v624_v32  ;;  %v1810_v31 = vadd.s32 24, %v1799_v23 }
 0x10d   : > { %v1273_v34 = vpop.f32.mrf.mxu0 }
 0x10e   : > { %680 = vst.msk [vmem:[%s1694_s17 + $0xc0] sm:$0xff] %vm655_vm2, %v625_v33  ;;  %v636_v35 = vadd.f32 %v1273_v34, %v1689_v45  ;;  %v1813_v33 = vadd.s32 32, %v1799_v23 }
 0x10f   : > { %v627_v36 = vpop.f32.mrf.mxu0 }
 0x110   : > { %683 = vst.msk [vmem:[%s1694_s17 + $0xd8] sm:$0xff] %vm655_vm2, %v636_v35  ;;  %v628_v37 = vadd.f32 %v1689_v45, %v627_v36 }
 0x111   : > { %v1276_v38 = vpop.f32.mrf.mxu0 }
 0x112   : > { %681 = vst.msk [vmem:[%s1694_s17 + $0xc8] sm:$0xff] %vm655_vm2, %v628_v37  ;;  %v649_v39 = vadd.f32 %v1276_v38, %v1689_v45  ;;  %v1823_v37 = vpop.permute.xlu1 %903 }
 0x113   : > { %v640_v40 = vpop.f32.mrf.mxu0 }
 0x114   : > { %686 = vst.msk [vmem:[%s1694_s17 + $0xf0] sm:$0xff] %vm655_vm2, %v649_v39  ;;  %v641_v41 = vadd.f32 %v1689_v45, %v640_v40 }
 0x115   : > { %v1277_v43 = vpop.f32.mrf.mxu0 }
 0x116   : > { %684 = vst.msk [vmem:[%s1694_s17 + $0xe0] sm:$0xff] %vm655_vm2, %v641_v41  ;;  %v652_v44 = vadd.f32 %v1277_v43, %v1689_v45 }
 0x117   : > { %v643_v46 = vpop.f32.mrf.mxu0 }
 0x118   : > { %687 = vst.msk [vmem:[%s1694_s17 + $0xf8] sm:$0xff] %vm655_vm2, %v652_v44  ;;  %v644_v47 = vadd.f32 %v1689_v45, %v643_v46 }
 0x11a   : > { %685 = vst.msk [vmem:[%s1694_s17 + $0xe8] sm:$0xff] %vm655_vm2, %v644_v47  ;;  %v789_v49 = vpop.f32.mrf.mxu1 }
 0x11b   : > { %v779_v50 = vpop.f32.mrf.mxu0  ;;  %v790_v57 = vadd.f32 %v789_v49, %v711_v51 }
 0x11c   : > { %v791_v52 = vpop.f32.mrf.mxu1  ;;  %v780_v58 = vadd.f32 %v779_v50, %v701_v42 }
 0x11d   : > { %v781_v53 = vpop.f32.mrf.mxu0  ;;  %v1792_v61 = vadd.f32 %v791_v52, %v711_v51  ;;  %v1842_v51 = vpop.permute.xlu1 %913 }
 0x11e   : > { %v793_v54 = vpop.f32.mrf.mxu1  ;;  %v1794_v62 = vadd.f32 %v781_v53, %v701_v42  ;;  %v806_v2 = vmax.f32 %v780_v58, %v790_v57  ;;  %v1829_v42 = vpop.permute.xlu0 %908 }
 0x11f   : > { %v783_v55 = vpop.f32.mrf.mxu0  ;;  %v794_v45 = vadd.f32 %v793_v54, %v716_v56 }
 0x120   : > { %v795_v59 = vpop.f32.mrf.mxu1  ;;  %v784_v63 = vadd.f32 %v783_v55, %v706_v48  ;;  %v816_v7 = vmax.f32 %v1794_v62, %v1792_v61 }
 0x121   : > { %v785_v60 = vpop.f32.mrf.mxu0  ;;  %v796_v3 = vadd.f32 %v795_v59, %v716_v56 }
 0x122   : > { %v799_v1 = vpop.f32.mrf.mxu1  ;;  %v786_v4 = vadd.f32 %v785_v60, %v706_v48  ;;  %v807_v8 = vmax.f32 %v784_v63, %v794_v45  ;;  %v964_v55 = vpop.permute.xlu0 %963 }
 0x123   : > { %v800_v5 = vadd.f32 %v799_v1, %v721_v0 }
 0x124   : > { %v801_v6 = vpop.f32.mrf.mxu1  ;;  %v817_v12 = vmax.f32 %v786_v4, %v796_v3 }
 0x125   : > { %v808_v9 = vmax.f32 %v806_v2, %v800_v5  ;;  %v802_v10 = vadd.f32 %v801_v6, %v721_v0 }
 0x126   : > { %v803_v11 = vpop.f32.mrf.mxu1 }
 0x127   : > { %v809_v13 = vmax.f32 %v808_v9, %v807_v8  ;;  %v818_v14 = vmax.f32 %v816_v7, %v802_v10 }
 0x128   : > { %v804_v15 = vpop.f32.mrf.mxu1 }
 0x129   : > { %v810_v16 = vrot.slane %v809_v13, 4  ;;  %v819_v17 = vmax.f32 %v818_v14, %v817_v12 }
 0x12b   : > { %v811_v19 = vmax.f32 %v809_v13, %v810_v16  ;;  %v820_v20 = vrot.slane %v819_v17, 4 }
 0x12d   : > { %v812_v21 = vrot.slane %v811_v19, 2  ;;  %v821_v22 = vmax.f32 %v819_v17, %v820_v20 }
 0x12f   : > { %v813_v24 = vmax.f32 %v811_v19, %v812_v21  ;;  %v822_v25 = vrot.slane %v821_v22, 2 }
 0x131   : > { %v814_v26 = vrot.slane %v813_v24, 1  ;;  %v823_v27 = vmax.f32 %v821_v22, %v822_v25 }
 0x133   : > { %v1807_v30 = vmax.f32 %v813_v24, %v814_v26  ;;  %v824_v32 = vrot.slane %v823_v27, 1 }
 0x135   : > { %vm832_vm3 = vcmp.eq.f32.partialorder %v780_v58, %v1807_v30  ;;  %vm834_vm4 = vcmp.eq.f32.partialorder %v784_v63, %v1807_v30  ;;  %vm836_vm5 = vcmp.eq.f32.partialorder %v790_v57, %v1807_v30  ;;  %vm838_vm6 = vcmp.eq.f32.partialorder %v794_v45, %v1807_v30  ;;  %v919_v63 = vpop.permute.xlu0 %918 }
 0x136   : > { %vm840_vm7 = vcmp.eq.f32.partialorder %v800_v5, %v1807_v30  ;;  %v842_v34 = vsel %vm832_vm3, %v1799_v23, 40  ;;  %v844_v35 = vsel %vm834_vm4, %v1802_v28, 40  ;;  %v846_v36 = vsel %vm836_vm5, %v1805_v29, 40 }
 0x137   : > { %v848_v38 = vsel %vm838_vm6, %v1810_v31, 40  ;;  %vm852_vm8 = vcmp.lt.s32.totalorder %v842_v34, %v846_v36  ;;  %v1826_v39 = vmax.f32 %v823_v27, %v824_v32  ;;  %v850_v40 = vsel %vm840_vm7, %v1813_v33, 40 }
 0x138   : > { %v853_v41 = vsel %vm852_vm8, %v842_v34, %v846_v36  ;;  %vm854_vm9 = vcmp.lt.s32.totalorder %v844_v35, %v848_v38 }
 0x139   : > { %v855_v43 = vsel %vm854_vm9, %v844_v35, %v848_v38  ;;  %vm856_vm10 = vcmp.lt.s32.totalorder %v853_v41, %v850_v40  ;;  %vm833_vm11 = vcmp.eq.f32.partialorder %v1794_v62, %v1826_v39  ;;  %vm835_vm12 = vcmp.eq.f32.partialorder %v786_v4, %v1826_v39  ;;  %v969_v62 = vpop.permute.xlu1 %968  ;;  %v924_v7 = vpop.permute.xlu0 %923 }
 0x13a   : > { %v857_v44 = vsel %vm856_vm10, %v853_v41, %v850_v40  ;;  %vm837_vm13 = vcmp.eq.f32.partialorder %v1792_v61, %v1826_v39  ;;  %vm839_vm14 = vcmp.eq.f32.partialorder %v796_v3, %v1826_v39  ;;  %vm841_vm15 = vcmp.eq.f32.partialorder %v802_v10, %v1826_v39 }
 0x13b   : > { %vm858_vm0 = vcmp.lt.s32.totalorder %v857_v44, %v855_v43  ;;  %v843_v46 = vsel %vm833_vm11, %v1799_v23, 40  ;;  %v845_v47 = vsel %vm835_vm12, %v1802_v28, 40  ;;  %v847_v48 = vsel %vm837_vm13, %v1805_v29, 40 }
 0x13c   : > { %v859_v49 = vsel %vm858_vm0, %v857_v44, %v855_v43  ;;  %v849_v50 = vsel %vm839_vm14, %v1810_v31, 40  ;;  %vm869_vm1 = vcmp.lt.s32.totalorder %v843_v46, %v847_v48  ;;  %v851_v53 = vsel %vm841_vm15, %v1813_v33, 40 }
 0x13d   : > { %v860_v52 = vrot.slane %v859_v49, 4  ;;  %v870_v54 = vsel %vm869_vm1, %v843_v46, %v847_v48  ;;  %vm871_vm2 = vcmp.lt.s32.totalorder %v845_v47, %v849_v50  ;;  %v974_v4 = vpop.permute.xlu1 %973  ;;  %v984_v25 = vpop.permute.xlu0 %983 }
 0x13e   : > { %vm873_vm3 = vcmp.lt.s32.totalorder %v870_v54, %v851_v53  ;;  %v872_v56 = vsel %vm871_vm2, %v845_v47, %v849_v50 }
 0x13f   : > { %vm861_vm4 = vcmp.lt.s32.totalorder %v859_v49, %v860_v52  ;;  %v874_v57 = vsel %vm873_vm3, %v870_v54, %v851_v53 }
 0x140   : > { %v862_v58 = vsel %vm861_vm4, %v859_v49, %v860_v52  ;;  %vm875_vm5 = vcmp.lt.s32.totalorder %v874_v57, %v872_v56 }
 0x141   : > { %v863_v59 = vrot.slane %v862_v58, 2  ;;  %v876_v60 = vsel %vm875_vm5, %v874_v57, %v872_v56  ;;  %v979_v19 = vpop.permute.xlu1 %978  ;;  %vm1040_vm5 = vcmp.lt.s32.totalorder %v826_v18, 256 }
 0x142   : > { %v877_v61 = vrot.slane %v876_v60, 4 }
 0x143   : > { %vm864_vm6 = vcmp.lt.s32.totalorder %v862_v58, %v863_v59 }
 0x144   : > { %v865_v45 = vsel %vm864_vm6, %v862_v58, %v863_v59  ;;  %vm878_vm7 = vcmp.lt.s32.totalorder %v876_v60, %v877_v61 }
 0x145   : > { %v866_v0 = vrot.slane %v865_v45, 1  ;;  %v879_v1 = vsel %vm878_vm7, %v876_v60, %v877_v61 }
 0x146   : > { %v880_v2 = vrot.slane %v879_v1, 2 }
 0x147   : > { %vm867_vm8 = vcmp.lt.s32.totalorder %v865_v45, %v866_v0 }
 0x148   : > { %v868_v3 = vsel %vm867_vm8, %v865_v45, %v866_v0  ;;  %vm881_vm12 = vcmp.lt.s32.totalorder %v879_v1, %v880_v2 }
 0x149   : > { %vm886_vm9 = vcmp.eq.s32.totalorder %v1799_v23, %v868_v3  ;;  %vm888_vm10 = vcmp.eq.s32.totalorder %v1802_v28, %v868_v3  ;;  %vm890_vm11 = vcmp.eq.s32.totalorder %v1805_v29, %v868_v3  ;;  %vm892_vm13 = vcmp.eq.s32.totalorder %v1810_v31, %v868_v3 }
 0x14a   : > { %v926_v5 = vsel %vm886_vm9, %v1823_v37, 0.0  ;;  %v928_v6 = vsel %vm888_vm10, %v1829_v42, 0.0  ;;  %v986_v9 = vsel %vm886_vm9, %v964_v55, 0.0  ;;  %v930_v10 = vsel %vm890_vm11, %v1842_v51, 0.0 }
 0x14b   : > { %v936_v8 = vadd.f32 %v928_v6, %v926_v5  ;;  %v988_v11 = vsel %vm888_vm10, %v969_v62, 0.0  ;;  %vm894_vm14 = vcmp.eq.s32.totalorder %v1813_v33, %v868_v3  ;;  %v882_v14 = vsel %vm881_vm12, %v879_v1, %v880_v2 }
 0x14c   : > { %v996_v13 = vadd.f32 %v988_v11, %v986_v9  ;;  %v932_v15 = vsel %vm892_vm13, %v919_v63, 0.0  ;;  %v990_v16 = vsel %vm890_vm11, %v974_v4, 0.0  ;;  %v883_v17 = vrot.slane %v882_v14, 1 }
 0x14d   : > { %v937_v12 = vadd.f32 %v936_v8, %v930_v10  ;;  %v934_v22 = vsel %vm894_vm14, %v924_v7, 0.0  ;;  %v992_v24 = vsel %vm892_vm13, %v979_v19, 0.0  ;;  %v994_v34 = vsel %vm894_vm14, %v984_v25, 0.0 }
 0x14e   : > { %v997_v21 = vadd.f32 %v996_v13, %v990_v16  ;;  %vm884_vm15 = vcmp.lt.s32.totalorder %v882_v14, %v883_v17 }
 0x14f   : > { %v938_v20 = vadd.f32 %v937_v12, %v932_v15  ;;  %v885_v32 = vsel %vm884_vm15, %v882_v14, %v883_v17 }
 0x150   : > { %v998_v27 = vadd.f32 %v997_v21, %v992_v24  ;;  %vm887_vm0 = vcmp.eq.s32.totalorder %v1799_v23, %v885_v32  ;;  %vm889_vm1 = vcmp.eq.s32.totalorder %v1802_v28, %v885_v32  ;;  %vm891_vm2 = vcmp.eq.s32.totalorder %v1805_v29, %v885_v32 }
 0x151   : > { %v939_v26 = vadd.f32 %v938_v20, %v934_v22  ;;  %v927_v38 = vsel %vm887_vm0, %v1823_v37, 0.0  ;;  %v929_v40 = vsel %vm889_vm1, %v1829_v42, 0.0  ;;  %vm893_vm3 = vcmp.eq.s32.totalorder %v1810_v31, %v885_v32 }
 0x152   : > { %v999_v36 = vadd.f32 %v998_v27, %v994_v34  ;;  %v946_v41 = vadd.f32 %v929_v40, %v927_v38  ;;  %v987_v43 = vsel %vm887_vm0, %v964_v55, 0.0  ;;  %v989_v44 = vsel %vm889_vm1, %v969_v62, 0.0 }
 0x153   : > { %v940_v35 = vrot.slane %v939_v26, 4  ;;  %v931_v46 = vsel %vm891_vm2, %v1842_v51, 0.0  ;;  %v1006_v47 = vadd.f32 %v989_v44, %v987_v43  ;;  %vm895_vm4 = vcmp.eq.s32.totalorder %v1813_v33, %v885_v32 }
 0x154   : > { %v947_v28 = vadd.f32 %v946_v41, %v931_v46  ;;  %v991_v49 = vsel %vm891_vm2, %v974_v4, 0.0  ;;  %v1000_v50 = vrot.slane %v999_v36, 4  ;;  %v933_v52 = vsel %vm893_vm3, %v919_v63, 0.0 }
 0x155   : > { %v941_v48 = vadd.f32 %v940_v35, %v939_v26  ;;  %v1007_v29 = vadd.f32 %v1006_v47, %v991_v49  ;;  %v993_v54 = vsel %vm893_vm3, %v979_v19, 0.0  ;;  %v935_v56 = vsel %vm895_vm4, %v924_v7, 0.0 }
 0x156   : > { %v948_v37 = vadd.f32 %v947_v28, %v933_v52  ;;  %v1001_v42 = vadd.f32 %v1000_v50, %v999_v36  ;;  %v995_v55 = vsel %vm895_vm4, %v984_v25, 0.0  ;;  %v1436_v4 = vmov 1966171168  }
 0x157   : > { %v942_v53 = vrot.slane %v941_v48, 2  ;;  %v1008_v31 = vadd.f32 %v1007_v29, %v993_v54  ;;  %v1024_v5 = vunpack.c.l.s4 %v1436_v4 }
 0x158   : > { %v949_v57 = vadd.f32 %v948_v37, %v935_v56  ;;  %v1002_v60 = vrot.slane %v1001_v42, 2 }
 0x159   : > { %v943_v58 = vadd.f32 %v942_v53, %v941_v48  ;;  %v1009_v51 = vadd.f32 %v1008_v31, %v995_v55  ;;  %v1025_v12 = vunpack.c.0.s8 %v1024_v5 }
 0x15a   : > { %v950_v59 = vrot.slane %v949_v57, 4  ;;  %v1003_v63 = vadd.f32 %v1002_v60, %v1001_v42 }
 0x15b   : > { %v1010_v61 = vrot.slane %v1009_v51, 4  ;;  %v944_v33 = vrot.slane %v943_v58, 1  ;;  %v1028_v19 = vsub.s32 %v1025_v12, %v1799_v23 }
 0x15c   : > { %v951_v62 = vadd.f32 %v950_v59, %v949_v57  ;;  %v1004_v8 = vrot.slane %v1003_v63, 1 }
 0x15d   : > { %v1011_v45 = vadd.f32 %v1010_v61, %v1009_v51  ;;  %v945_v2 = vadd.f32 %v944_v33, %v943_v58 }
 0x15e   : > { %v952_v0 = vrot.slane %v951_v62, 2  ;;  %v1005_v13 = vadd.f32 %v1004_v8, %v1003_v63 }
 0x15f   : > { %v1012_v1 = vrot.slane %v1011_v45, 2  ;;  %v1016_v11 = vsub.f32 %v945_v2, %v1807_v30 }
 0x160   : > { %v953_v3 = vadd.f32 %v952_v0, %v951_v62 }
 0x161   : > { %v1013_v6 = vadd.f32 %v1012_v1, %v1011_v45  ;;  %v1018_v16 = vmul.f32 %v1016_v11, %v1005_v13 }
 0x162   : > { %v954_v7 = vrot.slane %v953_v3, 1 }
 0x163   : > { %v1014_v9 = vrot.slane %v1013_v6, 1 }
 0x164   : > { %v955_v10 = vadd.f32 %v954_v7, %v953_v3 }
 0x165   : > { %v1015_v14 = vadd.f32 %v1014_v9, %v1013_v6 }
 0x166   : > { %v1017_v15 = vsub.f32 %v955_v10, %v1826_v39 }
 0x168   : > { %v1019_v17 = vmul.f32 %v1017_v15, %v1015_v14 }
 0x16a   : > { %v1022_v20 = vcombine.low %v1018_v16, %v1019_v17 }
 0x16c   : > { %v1029_v21 = vrot.slane %v1022_v20, %v1028_v19 }
 0x16e   : > { %v1036_v22 = vrot.slane %v1029_v21, %v1028_v19 }
 0x170   : > { %1042 = vst.msk [vmem:[%s307_s21] sm:$0x3] %vm1040_vm5, %v1036_v22 }
 0x171   : > { %1386 = shalt.err (!%p1383_p3)
}
 0x172   : > { %s1387_s17 = scalar_lea.hbm %s1065_s25, 32  ;;  %s1391_s20 = scalar_lea.hbm %s1915_s8, 64 }
 0x173   : > { %p1388_p4 = scmp.ne.s32.totalorder %s1065_s25, %s1387_s17  ;;  %p1392_p9 = scmp.lt.s32.totalorder %s1065_s25, %s1915_s8 }
 0x174   : > { %p1393_p10 = scmp.lt.s32.totalorder %s1391_s20, %s1387_s17 }
 0x175   : > { %p1389_p7 = pnand %p1388_p4, %p1518_p5 }
 0x176   : > { %p1394_p11 = por %p1393_p10, %p1392_p9 }
 0x177   : > { %p1390_p8 = pneg %p1389_p7 }
 0x179   : > { %p1395_p12 = pnand %p1394_p11, %p1390_p8 }
 0x17b   : > { %1398 = shalt.err (!%p1395_p12)
}
 0x17c   : > { %1311 = dma.vmem_to_hbm [thread:$0]  (%p1518_p5), %s1068_s18, 32, %s1065_s25, %s1049_s26  }
 0x17d PF: > { %p1317_p13 = scmp.ge.s32.totalorder %s1433_s30, 2  ;;  %s1087_s24 = sand.u32 1, %s1421_s27  }
 0x17e   : > { %s1088_s9 = scalar_lea.sflag [#allocation3], %s1087_s24 }
 0x17f   : > { %p1314_p0 = pnand %p1317_p13, %p1522_p6 }
 0x181   : > { %p1315_p1 = pneg %p1314_p0 }
 0x183   : > { %1416 = dma.done.wait (%p1315_p1), %s1088_s9, 32  }
 0x184   : > { %1418 = vsyncadd (%p1315_p1), %s1088_s9, 4294967264  ;;  %p19_p2 = scmp.ge.s32.totalorder %s1506_s11, 4   ;;  %s1918_s27 = smov %s1425_s28 }
 0x185   : > { %s1919_s28 = smov %s1429_s29  ;;  %s1920_s29 = smov %s1516_s14 }
 0x186   : > { %s1921_s30 = smov %s1506_s11  ;;  %21 = sbr.rel (!%p19_p2) target bundleno = 3 (0x3), region = 95 }
 0x18b   :  { %1093 = vsyncpa [#allocation3], 1 }
 0x18c   :  { %1095 = vsyncpa [#allocation3 + $0x1], 1 }

</bundles_post_ra>
